<compile_context>
chip_gen: v7x
topology: tpu7x:2x2x1
jax: 0.10.0
libtpu: 0.0.40
codegen_flags: <defaults>
</compile_context>

<pallas_src>
import functools

import jax
import jax.numpy as jnp
from jax import lax
from jax.experimental import pallas as pl
from jax.experimental.pallas import tpu as pltpu

LN_EPS = 1e-5


def _layer_norm(x, gamma, beta):
    # x: (M, D) f32, gamma/beta: (1, D) f32
    mean = jnp.mean(x, axis=-1, keepdims=True)
    var = jnp.mean(jnp.square(x - mean), axis=-1, keepdims=True)
    return (x - mean) * lax.rsqrt(var + LN_EPS) * gamma + beta


def block_kernel(
    x_ref, mask_ref,
    g1_ref, b1n_ref,
    wqkv_ref,
    wproj_ref, bproj_ref,
    g2_ref, b2n_ref,
    w1_ref, bb1_ref,
    w2_ref, bb2_ref,
    out_ref,
    *, num_heads, head_size, seq_len, batch_block,
):
    T = seq_len
    hs = head_size
    bb = batch_block

    x = x_ref[...]                                   # (Mb, D) f32
    Mb, D = x.shape

    # ---- LayerNorm 1 (f32) ----
    ln1 = _layer_norm(x, g1_ref[...], b1n_ref[...])

    # ---- Fused QKV projection: one wide bf16 matmul, f32 accumulation.
    #      hs**-0.5 is already folded into the Q columns host-side. ----
    qkv = jnp.dot(ln1.astype(jnp.bfloat16), wqkv_ref[...],
                  preferred_element_type=jnp.float32)        # (Mb, 3D) f32

    # Split + view per sequence: (Mb, D) -> (bb, T, D).  T % 8 == 0 (asserted
    # in the wrapper) keeps this a sublane-aligned, layout-free reshape.
    q = qkv[:, 0 * D:1 * D].astype(jnp.bfloat16).reshape(bb, T, D)
    k = qkv[:, 1 * D:2 * D].astype(jnp.bfloat16).reshape(bb, T, D)
    v = qkv[:, 2 * D:3 * D].astype(jnp.bfloat16).reshape(bb, T, D)

    mask_bias = mask_ref[...]                        # (T, T) additive causal bias

    # ---- Multi-head causal self-attention.
    # Batched over the batch dim (no Python batch unroll); heads (H <= 6)
    # remain a small static unroll with lane slices.  Each head's output is
    # immediately projection-accumulated into a full-width (Mb, D) f32
    # accumulator -> no concat scratch, no lane-sparse masked stores. ----
    attn = None
    for h in range(num_heads):
        c0 = h * hs
        qh = q[:, :, c0:c0 + hs]                     # (bb, T, hs) bf16
        kh = k[:, :, c0:c0 + hs]
        vh = v[:, :, c0:c0 + hs]
        # q @ k^T, contracting the head dim of both operands (no transpose).
        s = jnp.einsum('bqe,bke->bqk', qh, kh,
                       preferred_element_type=jnp.float32)   # (bb, T, T) f32
        s = s + mask_bias
        m = jnp.max(s, axis=-1, keepdims=True)
        e = jnp.exp(s - m)                                   # f32 (v5e-safe)
        denom = jnp.sum(e, axis=-1, keepdims=True)
        p = (e * pl.reciprocal(denom, approx=True)).astype(jnp.bfloat16)
        oh = jnp.einsum('bqk,bke->bqe', p, vh,
                        preferred_element_type=jnp.float32)  # (bb, T, hs) f32
        # Project this head's rows of Wproj and accumulate (thin-K matmul;
        # v7x MRB accumulates these in place).
        contrib = jnp.dot(oh.reshape(Mb, hs).astype(jnp.bfloat16),
                          wproj_ref[c0:c0 + hs, :],
                          preferred_element_type=jnp.float32)  # (Mb, D) f32
        attn = contrib if attn is None else attn + contrib

    x1 = x + attn + bproj_ref[...]                   # residual 1 (f32)

    # ---- LayerNorm 2 + FFN ----
    ln2 = _layer_norm(x1, g2_ref[...], b2n_ref[...])
    h1 = jnp.dot(ln2.astype(jnp.bfloat16), w1_ref[...],
                 preferred_element_type=jnp.float32) + bb1_ref[...]
    h1 = jnp.maximum(h1, 0.0)                        # ReLU in f32
    ffn_out = jnp.dot(h1.astype(jnp.bfloat16), w2_ref[...],
                      preferred_element_type=jnp.float32) + bb2_ref[...]

    out_ref[...] = x1 + ffn_out                      # residual 2


def transformer_block(x, params, *, num_heads, batch_block=None):
    """x: (B, T, D) float32 -> (B, T, D) float32."""
    B, T, D = x.shape
    assert D % num_heads == 0
    head_size = D // num_heads

    if batch_block is None:
        # Target ~1024 rows per grid step: good MXU M dim, fits the scoped
        # VMEM budget on every generation (v5e/v6e/v7x), and at production
        # shapes (B=64, T=256) yields grid=(16,) so the 'parallel' axis shards
        # cleanly across both v7x TensorCores.
        batch_block = max(1, min(B, 1024 // max(T, 1)))
        while B % batch_block:
            batch_block -= 1
    assert B % batch_block == 0
    nb = B // batch_block
    Mb = batch_block * T
    assert Mb % 8 == 0 or Mb == B * T, "row block must be sublane (8) aligned"
    assert batch_block == 1 or T % 8 == 0, \
        "in-kernel (Mb, D) <-> (bb, T, D) reshape needs T % 8 == 0"

    (g1, b1, wq, wk, wv, wproj, bproj, g2, b2, w1, bb1, w2, bb2) = params

    # Host-side fusion: fold the attention scale into the Q columns, fuse QKV
    # into one (D, 3D) weight, and pre-cast all MXU weight operands to bf16
    # (f32 accumulation happens in-kernel; LN params / biases stay f32).
    scale = head_size ** (-0.5)
    wqkv = jnp.concatenate([wq * scale, wk, wv], axis=1).astype(jnp.bfloat16)
    wproj_bf = wproj.astype(jnp.bfloat16)
    w1_bf = w1.astype(jnp.bfloat16)
    w2_bf = w2.astype(jnp.bfloat16)

    # Causal additive bias precomputed once host-side (finite, no -inf);
    # stays VMEM-resident across grid steps via the constant index_map.
    row = lax.broadcasted_iota(jnp.int32, (T, T), 0)
    col = lax.broadcasted_iota(jnp.int32, (T, T), 1)
    mask_bias = jnp.where(col <= row, 0.0, -1e30).astype(jnp.float32)

    x2d = x.reshape(B * T, D)                        # layout-preserving reshape

    kernel = functools.partial(block_kernel,
                               num_heads=num_heads, head_size=head_size,
                               seq_len=T, batch_block=batch_block)

    row_spec = pl.BlockSpec((Mb, D), lambda i: (i, 0))
    full = lambda shape: pl.BlockSpec(shape, lambda i: (0, 0))

    out2d = pl.pallas_call(
        kernel,
        out_shape=jax.ShapeDtypeStruct((B * T, D), jnp.float32),
        grid_spec=pltpu.PrefetchScalarGridSpec(
            num_scalar_prefetch=0,
            grid=(nb,),
            in_specs=[
                row_spec,                               # x  (rows of (B*T, D))
                full((T, T)),                           # causal additive bias
                full((1, D)), full((1, D)),             # ln1 gamma, beta
                full((D, 3 * D)),                       # fused Wqkv (bf16, q pre-scaled)
                full((D, D)), full((1, D)),             # Wproj (bf16), bproj
                full((1, D)), full((1, D)),             # ln2 gamma, beta
                full((D, 4 * D)), full((1, 4 * D)),     # FFN W1 (bf16), b1
                full((4 * D, D)), full((1, D)),         # FFN W2 (bf16), b2
            ],
            out_specs=row_spec,
        ),
        compiler_params=pltpu.CompilerParams(
            dimension_semantics=("parallel",),
            # ~20 MiB live at Mb~1024; 48 MiB leaves room for Mb up to ~2048
            # and is still within v7x's 64 MiB physical VMEM.
            vmem_limit_bytes=48 * 1024 * 1024,
        ),
    )(x2d, mask_bias, g1, b1, wqkv, wproj_bf, bproj, g2, b2, w1_bf, bb1, w2_bf, bb2)
    return out2d.reshape(B, T, D)


def init_params(key, D, num_heads):
    """Deterministic synthetic parameters (not a checkpoint load)."""
    ks = jax.random.split(key, 8)
    scale = 0.02
    wq = scale * jax.random.normal(ks[0], (D, D), jnp.float32)
    wk = scale * jax.random.normal(ks[1], (D, D), jnp.float32)
    wv = scale * jax.random.normal(ks[2], (D, D), jnp.float32)
    wproj = scale * jax.random.normal(ks[3], (D, D), jnp.float32)
    bproj = jnp.zeros((1, D), jnp.float32)
    g1 = jnp.ones((1, D), jnp.float32)
    b1 = jnp.zeros((1, D), jnp.float32)
    g2 = jnp.ones((1, D), jnp.float32)
    b2 = jnp.zeros((1, D), jnp.float32)
    w1 = scale * jax.random.normal(ks[4], (D, 4 * D), jnp.float32)
    bb1 = 0.01 * jnp.ones((1, 4 * D), jnp.float32)
    w2 = scale * jax.random.normal(ks[5], (4 * D, D), jnp.float32)
    bb2 = 0.01 * jnp.ones((1, D), jnp.float32)
    return (g1, b1, wq, wk, wv, wproj, bproj, g2, b2, w1, bb1, w2, bb2)


def reference_block(x, params, *, num_heads):
    """Pure-JAX f32 reference mirroring the PyTorch forward (eval mode)."""
    (g1, b1, wq, wk, wv, wproj, bproj, g2, b2, w1, bb1, w2, bb2) = params
    B, T, D = x.shape
    hs = D // num_heads

    def ln(y, g, b):
        m = jnp.mean(y, -1, keepdims=True)
        v = jnp.mean((y - m) ** 2, -1, keepdims=True)
        return (y - m) / jnp.sqrt(v + LN_EPS) * g + b

    l1 = ln(x, g1, b1)
    q = l1 @ wq; k = l1 @ wk; v = l1 @ wv
    outs = []
    mask = jnp.tril(jnp.ones((T, T), bool))
    for h in range(num_heads):
        sl = slice(h * hs, (h + 1) * hs)
        wei = jnp.einsum("btd,bsd->bts", q[..., sl], k[..., sl]) * hs ** -0.5
        wei = jnp.where(mask, wei, -jnp.inf)
        wei = jax.nn.softmax(wei, axis=-1)
        outs.append(jnp.einsum("bts,bsd->btd", wei, v[..., sl]))
    attn = jnp.concatenate(outs, -1) @ wproj + bproj
    x1 = x + attn
    l2 = ln(x1, g2, b2)
    ffn = jnp.maximum(l2 @ w1 + bb1, 0.0) @ w2 + bb2
    return x1 + ffn


if __name__ == "__main__":
    B, T, D, H = 2, 8, 32, 4   # small shapes: batch=2, seq=8, n_embd=32, 4 heads
    key = jax.random.PRNGKey(0)
    kx, kp = jax.random.split(key)
    x = jax.random.normal(kx, (B, T, D), jnp.float32)
    params = init_params(kp, D, H)

    # batch_block=1 here exercises a multi-step parallel grid (grid=(2,)).
    # At production shapes (B=64, T=256) the default picks batch_block=4
    # (Mb=1024, grid=(16,)).
    out = transformer_block(x, params, num_heads=H, batch_block=1)
    out = jax.block_until_ready(out)

    ref = reference_block(x, params, num_heads=H)
    assert out.shape == (B, T, D)
    # bf16 MXU operands -> looser tolerance vs the f32 reference.
    assert jnp.allclose(out, ref, atol=2e-2, rtol=2e-2), (
        f"mismatch vs reference (max abs err {jnp.max(jnp.abs(out - ref))})")

    print("KERNEL_OK")
</pallas_src>

<mosaic_0001>
module attributes {stable_mosaic.version = 11 : i64} {
  func.func @block_kernel(%arg0: i32, %arg1: memref<8x32xf32, #tpu.memory_space<vmem>>, %arg2: memref<8x8xf32, #tpu.memory_space<vmem>>, %arg3: memref<1x32xf32, #tpu.memory_space<vmem>>, %arg4: memref<1x32xf32, #tpu.memory_space<vmem>>, %arg5: memref<32x96xbf16, #tpu.memory_space<vmem>>, %arg6: memref<32x32xbf16, #tpu.memory_space<vmem>>, %arg7: memref<1x32xf32, #tpu.memory_space<vmem>>, %arg8: memref<1x32xf32, #tpu.memory_space<vmem>>, %arg9: memref<1x32xf32, #tpu.memory_space<vmem>>, %arg10: memref<32x128xbf16, #tpu.memory_space<vmem>>, %arg11: memref<1x128xf32, #tpu.memory_space<vmem>>, %arg12: memref<128x32xbf16, #tpu.memory_space<vmem>>, %arg13: memref<1x32xf32, #tpu.memory_space<vmem>>, %arg14: memref<8x32xf32, #tpu.memory_space<vmem>>) attributes {dimension_semantics = [#tpu.dimension_semantics<parallel>], iteration_bounds = array<i64: 2>, scalar_prefetch = 0 : i64, scratch_operands = 0 : i64, tpu.core_type = #tpu.core_type<tc>, window_params = [{transform_indices = @transform_0, window_bounds = array<i64: 8, 32>}, {pipeline_mode = #tpu.pipeline_mode<synchronous>, transform_indices = @transform_1, window_bounds = array<i64: 8, 8>}, {pipeline_mode = #tpu.pipeline_mode<synchronous>, transform_indices = @transform_2, window_bounds = array<i64: 1, 32>}, {pipeline_mode = #tpu.pipeline_mode<synchronous>, transform_indices = @transform_3, window_bounds = array<i64: 1, 32>}, {pipeline_mode = #tpu.pipeline_mode<synchronous>, transform_indices = @transform_4, window_bounds = array<i64: 32, 96>}, {pipeline_mode = #tpu.pipeline_mode<synchronous>, transform_indices = @transform_5, window_bounds = array<i64: 32, 32>}, {pipeline_mode = #tpu.pipeline_mode<synchronous>, transform_indices = @transform_6, window_bounds = array<i64: 1, 32>}, {pipeline_mode = #tpu.pipeline_mode<synchronous>, transform_indices = @transform_7, window_bounds = array<i64: 1, 32>}, {pipeline_mode = #tpu.pipeline_mode<synchronous>, transform_indices = @transform_8, window_bounds = array<i64: 1, 32>}, {pipeline_mode = #tpu.pipeline_mode<synchronous>, transform_indices = @transform_9, window_bounds = array<i64: 32, 128>}, {pipeline_mode = #tpu.pipeline_mode<synchronous>, transform_indices = @transform_10, window_bounds = array<i64: 1, 128>}, {pipeline_mode = #tpu.pipeline_mode<synchronous>, transform_indices = @transform_11, window_bounds = array<i64: 128, 32>}, {pipeline_mode = #tpu.pipeline_mode<synchronous>, transform_indices = @transform_12, window_bounds = array<i64: 1, 32>}, {transform_indices = @transform_13, window_bounds = array<i64: 8, 32>}]} {
    %c0 = arith.constant 0 : index
    %c0_0 = arith.constant 0 : index
    %0 = vector.load %arg1[%c0, %c0_0] : memref<8x32xf32, #tpu.memory_space<vmem>>, vector<8x32xf32>
    %c0_1 = arith.constant 0 : index
    %c0_2 = arith.constant 0 : index
    %1 = vector.load %arg3[%c0_1, %c0_2] : memref<1x32xf32, #tpu.memory_space<vmem>>, vector<1x32xf32>
    %c0_3 = arith.constant 0 : index
    %c0_4 = arith.constant 0 : index
    %2 = vector.load %arg4[%c0_3, %c0_4] : memref<1x32xf32, #tpu.memory_space<vmem>>, vector<1x32xf32>
    %cst = arith.constant dense<0.000000e+00> : vector<8xf32>
    %3 = vector.multi_reduction <add>, %0, %cst [1] : vector<8x32xf32> to vector<8xf32>
    %4 = vector.shape_cast %3 : vector<8xf32> to vector<8x1xf32>
    %cst_5 = arith.constant 3.200000e+01 : f32
    %5 = vector.broadcast %cst_5 : f32 to vector<8x1xf32>
    %6 = arith.divf %4, %5 : vector<8x1xf32>
    %7 = vector.broadcast %6 : vector<8x1xf32> to vector<8x32xf32>
    %8 = arith.subf %0, %7 : vector<8x32xf32>
    %9 = arith.mulf %8, %8 : vector<8x32xf32>
    %cst_6 = arith.constant dense<0.000000e+00> : vector<8xf32>
    %10 = vector.multi_reduction <add>, %9, %cst_6 [1] : vector<8x32xf32> to vector<8xf32>
    %11 = vector.shape_cast %10 : vector<8xf32> to vector<8x1xf32>
    %cst_7 = arith.constant 3.200000e+01 : f32
    %12 = vector.broadcast %cst_7 : f32 to vector<8x1xf32>
    %13 = arith.divf %11, %12 : vector<8x1xf32>
    %14 = vector.broadcast %6 : vector<8x1xf32> to vector<8x32xf32>
    %15 = arith.subf %0, %14 : vector<8x32xf32>
    %cst_8 = arith.constant 9.99999974E-6 : f32
    %16 = vector.broadcast %cst_8 : f32 to vector<8x1xf32>
    %17 = arith.addf %13, %16 : vector<8x1xf32>
    %18 = math.rsqrt %17 : vector<8x1xf32>
    %19 = vector.broadcast %18 : vector<8x1xf32> to vector<8x32xf32>
    %20 = arith.mulf %15, %19 : vector<8x32xf32>
    %21 = vector.broadcast %1 : vector<1x32xf32> to vector<8x32xf32>
    %22 = arith.mulf %20, %21 : vector<8x32xf32>
    %23 = vector.broadcast %2 : vector<1x32xf32> to vector<8x32xf32>
    %24 = arith.addf %22, %23 : vector<8x32xf32>
    %25 = arith.truncf %24 : vector<8x32xf32> to vector<8x32xbf16>
    %c0_9 = arith.constant 0 : index
    %c0_10 = arith.constant 0 : index
    %26 = vector.load %arg5[%c0_9, %c0_10] : memref<32x96xbf16, #tpu.memory_space<vmem>>, vector<32x96xbf16>
    %cst_11 = arith.constant dense<0.000000e+00> : vector<8x96xf32>
    %27 = tpu.matmul %25, %26, %cst_11 {dimension_numbers = #tpu.dot_dimension_numbers<[1], [0], [0], [1], [0, 0, 1, 1], [], []>} : vector<8x32xbf16>, vector<32x96xbf16>, vector<8x96xf32> -> vector<8x96xf32>
    %28 = vector.extract_strided_slice %27 {offsets = [0, 0], sizes = [8, 32], strides = [1, 1]} : vector<8x96xf32> to vector<8x32xf32>
    %29 = arith.truncf %28 : vector<8x32xf32> to vector<8x32xbf16>
    %30 = vector.shape_cast %29 : vector<8x32xbf16> to vector<1x8x32xbf16>
    %31 = vector.extract_strided_slice %27 {offsets = [0, 32], sizes = [8, 32], strides = [1, 1]} : vector<8x96xf32> to vector<8x32xf32>
    %32 = arith.truncf %31 : vector<8x32xf32> to vector<8x32xbf16>
    %33 = vector.shape_cast %32 : vector<8x32xbf16> to vector<1x8x32xbf16>
    %34 = vector.extract_strided_slice %27 {offsets = [0, 64], sizes = [8, 32], strides = [1, 1]} : vector<8x96xf32> to vector<8x32xf32>
    %35 = arith.truncf %34 : vector<8x32xf32> to vector<8x32xbf16>
    %36 = vector.shape_cast %35 : vector<8x32xbf16> to vector<1x8x32xbf16>
    %c0_12 = arith.constant 0 : index
    %c0_13 = arith.constant 0 : index
    %37 = vector.load %arg2[%c0_12, %c0_13] : memref<8x8xf32, #tpu.memory_space<vmem>>, vector<8x8xf32>
    %38 = vector.extract_strided_slice %30 {offsets = [0, 0, 0], sizes = [1, 8, 8], strides = [1, 1, 1]} : vector<1x8x32xbf16> to vector<1x8x8xbf16>
    %39 = vector.extract_strided_slice %33 {offsets = [0, 0, 0], sizes = [1, 8, 8], strides = [1, 1, 1]} : vector<1x8x32xbf16> to vector<1x8x8xbf16>
    %40 = vector.extract_strided_slice %36 {offsets = [0, 0, 0], sizes = [1, 8, 8], strides = [1, 1, 1]} : vector<1x8x32xbf16> to vector<1x8x8xbf16>
    "tpu.trace_start"() <{level = 10 : i32, message = "bqe,bke->bqk"}> : () -> ()
    %cst_14 = arith.constant dense<0.000000e+00> : vector<1x8x8xf32>
    %41 = tpu.matmul %38, %39, %cst_14 {dimension_numbers = #tpu.dot_dimension_numbers<[2], [2], [1], [1], [0, 0, 0, 1, 1, 1], [0], [0]>} : vector<1x8x8xbf16>, vector<1x8x8xbf16>, vector<1x8x8xf32> -> vector<1x8x8xf32>
    "tpu.trace_stop"() : () -> ()
    %42 = vector.shape_cast %37 : vector<8x8xf32> to vector<1x8x8xf32>
    %43 = arith.addf %41, %42 : vector<1x8x8xf32>
    %cst_15 = arith.constant dense<0xFF800000> : vector<1x8xf32>
    %44 = vector.multi_reduction <maximumf>, %43, %cst_15 [2] : vector<1x8x8xf32> to vector<1x8xf32>
    %45 = vector.shape_cast %44 : vector<1x8xf32> to vector<1x8x1xf32>
    %46 = vector.broadcast %45 : vector<1x8x1xf32> to vector<1x8x8xf32>
    %47 = arith.subf %43, %46 : vector<1x8x8xf32>
    %48 = math.exp %47 : vector<1x8x8xf32>
    %cst_16 = arith.constant dense<0.000000e+00> : vector<1x8xf32>
    %49 = vector.multi_reduction <add>, %48, %cst_16 [2] : vector<1x8x8xf32> to vector<1x8xf32>
    %50 = vector.shape_cast %49 : vector<1x8xf32> to vector<1x8x1xf32>
    %51 = tpu.reciprocal %50 {approx = true} : vector<1x8x1xf32> -> vector<1x8x1xf32>
    %52 = vector.broadcast %51 : vector<1x8x1xf32> to vector<1x8x8xf32>
    %53 = arith.mulf %48, %52 : vector<1x8x8xf32>
    %54 = arith.truncf %53 : vector<1x8x8xf32> to vector<1x8x8xbf16>
    "tpu.trace_start"() <{level = 10 : i32, message = "bqk,bke->bqe"}> : () -> ()
    %cst_17 = arith.constant dense<0.000000e+00> : vector<1x8x8xf32>
    %55 = tpu.matmul %54, %40, %cst_17 {dimension_numbers = #tpu.dot_dimension_numbers<[2], [1], [1], [2], [0, 0, 0, 1, 1, 2], [0], [0]>} : vector<1x8x8xbf16>, vector<1x8x8xbf16>, vector<1x8x8xf32> -> vector<1x8x8xf32>
    "tpu.trace_stop"() : () -> ()
    %56 = vector.shape_cast %55 : vector<1x8x8xf32> to vector<8x8xf32>
    %57 = arith.truncf %56 : vector<8x8xf32> to vector<8x8xbf16>
    %c0_18 = arith.constant 0 : index
    %c0_19 = arith.constant 0 : index
    %58 = vector.load %arg6[%c0_18, %c0_19] : memref<32x32xbf16, #tpu.memory_space<vmem>>, vector<8x32xbf16>
    %cst_20 = arith.constant dense<0.000000e+00> : vector<8x32xf32>
    %59 = tpu.matmul %57, %58, %cst_20 {dimension_numbers = #tpu.dot_dimension_numbers<[1], [0], [0], [1], [0, 0, 1, 1], [], []>} : vector<8x8xbf16>, vector<8x32xbf16>, vector<8x32xf32> -> vector<8x32xf32>
    %60 = vector.extract_strided_slice %30 {offsets = [0, 0, 8], sizes = [1, 8, 8], strides = [1, 1, 1]} : vector<1x8x32xbf16> to vector<1x8x8xbf16>
    %61 = vector.extract_strided_slice %33 {offsets = [0, 0, 8], sizes = [1, 8, 8], strides = [1, 1, 1]} : vector<1x8x32xbf16> to vector<1x8x8xbf16>
    %62 = vector.extract_strided_slice %36 {offsets = [0, 0, 8], sizes = [1, 8, 8], strides = [1, 1, 1]} : vector<1x8x32xbf16> to vector<1x8x8xbf16>
    "tpu.trace_start"() <{level = 10 : i32, message = "bqe,bke->bqk"}> : () -> ()
    %cst_21 = arith.constant dense<0.000000e+00> : vector<1x8x8xf32>
    %63 = tpu.matmul %60, %61, %cst_21 {dimension_numbers = #tpu.dot_dimension_numbers<[2], [2], [1], [1], [0, 0, 0, 1, 1, 1], [0], [0]>} : vector<1x8x8xbf16>, vector<1x8x8xbf16>, vector<1x8x8xf32> -> vector<1x8x8xf32>
    "tpu.trace_stop"() : () -> ()
    %64 = vector.shape_cast %37 : vector<8x8xf32> to vector<1x8x8xf32>
    %65 = arith.addf %63, %64 : vector<1x8x8xf32>
    %cst_22 = arith.constant dense<0xFF800000> : vector<1x8xf32>
    %66 = vector.multi_reduction <maximumf>, %65, %cst_22 [2] : vector<1x8x8xf32> to vector<1x8xf32>
    %67 = vector.shape_cast %66 : vector<1x8xf32> to vector<1x8x1xf32>
    %68 = vector.broadcast %67 : vector<1x8x1xf32> to vector<1x8x8xf32>
    %69 = arith.subf %65, %68 : vector<1x8x8xf32>
    %70 = math.exp %69 : vector<1x8x8xf32>
    %cst_23 = arith.constant dense<0.000000e+00> : vector<1x8xf32>
    %71 = vector.multi_reduction <add>, %70, %cst_23 [2] : vector<1x8x8xf32> to vector<1x8xf32>
    %72 = vector.shape_cast %71 : vector<1x8xf32> to vector<1x8x1xf32>
    %73 = tpu.reciprocal %72 {approx = true} : vector<1x8x1xf32> -> vector<1x8x1xf32>
    %74 = vector.broadcast %73 : vector<1x8x1xf32> to vector<1x8x8xf32>
    %75 = arith.mulf %70, %74 : vector<1x8x8xf32>
    %76 = arith.truncf %75 : vector<1x8x8xf32> to vector<1x8x8xbf16>
    "tpu.trace_start"() <{level = 10 : i32, message = "bqk,bke->bqe"}> : () -> ()
    %cst_24 = arith.constant dense<0.000000e+00> : vector<1x8x8xf32>
    %77 = tpu.matmul %76, %62, %cst_24 {dimension_numbers = #tpu.dot_dimension_numbers<[2], [1], [1], [2], [0, 0, 0, 1, 1, 2], [0], [0]>} : vector<1x8x8xbf16>, vector<1x8x8xbf16>, vector<1x8x8xf32> -> vector<1x8x8xf32>
    "tpu.trace_stop"() : () -> ()
    %78 = vector.shape_cast %77 : vector<1x8x8xf32> to vector<8x8xf32>
    %79 = arith.truncf %78 : vector<8x8xf32> to vector<8x8xbf16>
    %c8 = arith.constant 8 : index
    %c0_25 = arith.constant 0 : index
    %80 = vector.load %arg6[%c8, %c0_25] : memref<32x32xbf16, #tpu.memory_space<vmem>>, vector<8x32xbf16>
    %cst_26 = arith.constant dense<0.000000e+00> : vector<8x32xf32>
    %81 = tpu.matmul %79, %80, %cst_26 {dimension_numbers = #tpu.dot_dimension_numbers<[1], [0], [0], [1], [0, 0, 1, 1], [], []>} : vector<8x8xbf16>, vector<8x32xbf16>, vector<8x32xf32> -> vector<8x32xf32>
    %82 = arith.addf %59, %81 : vector<8x32xf32>
    %83 = vector.extract_strided_slice %30 {offsets = [0, 0, 16], sizes = [1, 8, 8], strides = [1, 1, 1]} : vector<1x8x32xbf16> to vector<1x8x8xbf16>
    %84 = vector.extract_strided_slice %33 {offsets = [0, 0, 16], sizes = [1, 8, 8], strides = [1, 1, 1]} : vector<1x8x32xbf16> to vector<1x8x8xbf16>
    %85 = vector.extract_strided_slice %36 {offsets = [0, 0, 16], sizes = [1, 8, 8], strides = [1, 1, 1]} : vector<1x8x32xbf16> to vector<1x8x8xbf16>
    "tpu.trace_start"() <{level = 10 : i32, message = "bqe,bke->bqk"}> : () -> ()
    %cst_27 = arith.constant dense<0.000000e+00> : vector<1x8x8xf32>
    %86 = tpu.matmul %83, %84, %cst_27 {dimension_numbers = #tpu.dot_dimension_numbers<[2], [2], [1], [1], [0, 0, 0, 1, 1, 1], [0], [0]>} : vector<1x8x8xbf16>, vector<1x8x8xbf16>, vector<1x8x8xf32> -> vector<1x8x8xf32>
    "tpu.trace_stop"() : () -> ()
    %87 = vector.shape_cast %37 : vector<8x8xf32> to vector<1x8x8xf32>
    %88 = arith.addf %86, %87 : vector<1x8x8xf32>
    %cst_28 = arith.constant dense<0xFF800000> : vector<1x8xf32>
    %89 = vector.multi_reduction <maximumf>, %88, %cst_28 [2] : vector<1x8x8xf32> to vector<1x8xf32>
    %90 = vector.shape_cast %89 : vector<1x8xf32> to vector<1x8x1xf32>
    %91 = vector.broadcast %90 : vector<1x8x1xf32> to vector<1x8x8xf32>
    %92 = arith.subf %88, %91 : vector<1x8x8xf32>
    %93 = math.exp %92 : vector<1x8x8xf32>
    %cst_29 = arith.constant dense<0.000000e+00> : vector<1x8xf32>
    %94 = vector.multi_reduction <add>, %93, %cst_29 [2] : vector<1x8x8xf32> to vector<1x8xf32>
    %95 = vector.shape_cast %94 : vector<1x8xf32> to vector<1x8x1xf32>
    %96 = tpu.reciprocal %95 {approx = true} : vector<1x8x1xf32> -> vector<1x8x1xf32>
    %97 = vector.broadcast %96 : vector<1x8x1xf32> to vector<1x8x8xf32>
    %98 = arith.mulf %93, %97 : vector<1x8x8xf32>
    %99 = arith.truncf %98 : vector<1x8x8xf32> to vector<1x8x8xbf16>
    "tpu.trace_start"() <{level = 10 : i32, message = "bqk,bke->bqe"}> : () -> ()
    %cst_30 = arith.constant dense<0.000000e+00> : vector<1x8x8xf32>
    %100 = tpu.matmul %99, %85, %cst_30 {dimension_numbers = #tpu.dot_dimension_numbers<[2], [1], [1], [2], [0, 0, 0, 1, 1, 2], [0], [0]>} : vector<1x8x8xbf16>, vector<1x8x8xbf16>, vector<1x8x8xf32> -> vector<1x8x8xf32>
    "tpu.trace_stop"() : () -> ()
    %101 = vector.shape_cast %100 : vector<1x8x8xf32> to vector<8x8xf32>
    %102 = arith.truncf %101 : vector<8x8xf32> to vector<8x8xbf16>
    %c16 = arith.constant 16 : index
    %c0_31 = arith.constant 0 : index
    %103 = vector.load %arg6[%c16, %c0_31] : memref<32x32xbf16, #tpu.memory_space<vmem>>, vector<8x32xbf16>
    %cst_32 = arith.constant dense<0.000000e+00> : vector<8x32xf32>
    %104 = tpu.matmul %102, %103, %cst_32 {dimension_numbers = #tpu.dot_dimension_numbers<[1], [0], [0], [1], [0, 0, 1, 1], [], []>} : vector<8x8xbf16>, vector<8x32xbf16>, vector<8x32xf32> -> vector<8x32xf32>
    %105 = arith.addf %82, %104 : vector<8x32xf32>
    %106 = vector.extract_strided_slice %30 {offsets = [0, 0, 24], sizes = [1, 8, 8], strides = [1, 1, 1]} : vector<1x8x32xbf16> to vector<1x8x8xbf16>
    %107 = vector.extract_strided_slice %33 {offsets = [0, 0, 24], sizes = [1, 8, 8], strides = [1, 1, 1]} : vector<1x8x32xbf16> to vector<1x8x8xbf16>
    %108 = vector.extract_strided_slice %36 {offsets = [0, 0, 24], sizes = [1, 8, 8], strides = [1, 1, 1]} : vector<1x8x32xbf16> to vector<1x8x8xbf16>
    "tpu.trace_start"() <{level = 10 : i32, message = "bqe,bke->bqk"}> : () -> ()
    %cst_33 = arith.constant dense<0.000000e+00> : vector<1x8x8xf32>
    %109 = tpu.matmul %106, %107, %cst_33 {dimension_numbers = #tpu.dot_dimension_numbers<[2], [2], [1], [1], [0, 0, 0, 1, 1, 1], [0], [0]>} : vector<1x8x8xbf16>, vector<1x8x8xbf16>, vector<1x8x8xf32> -> vector<1x8x8xf32>
    "tpu.trace_stop"() : () -> ()
    %110 = vector.shape_cast %37 : vector<8x8xf32> to vector<1x8x8xf32>
    %111 = arith.addf %109, %110 : vector<1x8x8xf32>
    %cst_34 = arith.constant dense<0xFF800000> : vector<1x8xf32>
    %112 = vector.multi_reduction <maximumf>, %111, %cst_34 [2] : vector<1x8x8xf32> to vector<1x8xf32>
    %113 = vector.shape_cast %112 : vector<1x8xf32> to vector<1x8x1xf32>
    %114 = vector.broadcast %113 : vector<1x8x1xf32> to vector<1x8x8xf32>
    %115 = arith.subf %111, %114 : vector<1x8x8xf32>
    %116 = math.exp %115 : vector<1x8x8xf32>
    %cst_35 = arith.constant dense<0.000000e+00> : vector<1x8xf32>
    %117 = vector.multi_reduction <add>, %116, %cst_35 [2] : vector<1x8x8xf32> to vector<1x8xf32>
    %118 = vector.shape_cast %117 : vector<1x8xf32> to vector<1x8x1xf32>
    %119 = tpu.reciprocal %118 {approx = true} : vector<1x8x1xf32> -> vector<1x8x1xf32>
    %120 = vector.broadcast %119 : vector<1x8x1xf32> to vector<1x8x8xf32>
    %121 = arith.mulf %116, %120 : vector<1x8x8xf32>
    %122 = arith.truncf %121 : vector<1x8x8xf32> to vector<1x8x8xbf16>
    "tpu.trace_start"() <{level = 10 : i32, message = "bqk,bke->bqe"}> : () -> ()
    %cst_36 = arith.constant dense<0.000000e+00> : vector<1x8x8xf32>
    %123 = tpu.matmul %122, %108, %cst_36 {dimension_numbers = #tpu.dot_dimension_numbers<[2], [1], [1], [2], [0, 0, 0, 1, 1, 2], [0], [0]>} : vector<1x8x8xbf16>, vector<1x8x8xbf16>, vector<1x8x8xf32> -> vector<1x8x8xf32>
    "tpu.trace_stop"() : () -> ()
    %124 = vector.shape_cast %123 : vector<1x8x8xf32> to vector<8x8xf32>
    %125 = arith.truncf %124 : vector<8x8xf32> to vector<8x8xbf16>
    %c24 = arith.constant 24 : index
    %c0_37 = arith.constant 0 : index
    %126 = vector.load %arg6[%c24, %c0_37] : memref<32x32xbf16, #tpu.memory_space<vmem>>, vector<8x32xbf16>
    %cst_38 = arith.constant dense<0.000000e+00> : vector<8x32xf32>
    %127 = tpu.matmul %125, %126, %cst_38 {dimension_numbers = #tpu.dot_dimension_numbers<[1], [0], [0], [1], [0, 0, 1, 1], [], []>} : vector<8x8xbf16>, vector<8x32xbf16>, vector<8x32xf32> -> vector<8x32xf32>
    %128 = arith.addf %105, %127 : vector<8x32xf32>
    %129 = arith.addf %0, %128 : vector<8x32xf32>
    %c0_39 = arith.constant 0 : index
    %c0_40 = arith.constant 0 : index
    %130 = vector.load %arg7[%c0_39, %c0_40] : memref<1x32xf32, #tpu.memory_space<vmem>>, vector<1x32xf32>
    %131 = vector.broadcast %130 : vector<1x32xf32> to vector<8x32xf32>
    %132 = arith.addf %129, %131 : vector<8x32xf32>
    %c0_41 = arith.constant 0 : index
    %c0_42 = arith.constant 0 : index
    %133 = vector.load %arg8[%c0_41, %c0_42] : memref<1x32xf32, #tpu.memory_space<vmem>>, vector<1x32xf32>
    %c0_43 = arith.constant 0 : index
    %c0_44 = arith.constant 0 : index
    %134 = vector.load %arg9[%c0_43, %c0_44] : memref<1x32xf32, #tpu.memory_space<vmem>>, vector<1x32xf32>
    %cst_45 = arith.constant dense<0.000000e+00> : vector<8xf32>
    %135 = vector.multi_reduction <add>, %132, %cst_45 [1] : vector<8x32xf32> to vector<8xf32>
    %136 = vector.shape_cast %135 : vector<8xf32> to vector<8x1xf32>
    %cst_46 = arith.constant 3.200000e+01 : f32
    %137 = vector.broadcast %cst_46 : f32 to vector<8x1xf32>
    %138 = arith.divf %136, %137 : vector<8x1xf32>
    %139 = vector.broadcast %138 : vector<8x1xf32> to vector<8x32xf32>
    %140 = arith.subf %132, %139 : vector<8x32xf32>
    %141 = arith.mulf %140, %140 : vector<8x32xf32>
    %cst_47 = arith.constant dense<0.000000e+00> : vector<8xf32>
    %142 = vector.multi_reduction <add>, %141, %cst_47 [1] : vector<8x32xf32> to vector<8xf32>
    %143 = vector.shape_cast %142 : vector<8xf32> to vector<8x1xf32>
    %cst_48 = arith.constant 3.200000e+01 : f32
    %144 = vector.broadcast %cst_48 : f32 to vector<8x1xf32>
    %145 = arith.divf %143, %144 : vector<8x1xf32>
    %146 = vector.broadcast %138 : vector<8x1xf32> to vector<8x32xf32>
    %147 = arith.subf %132, %146 : vector<8x32xf32>
    %cst_49 = arith.constant 9.99999974E-6 : f32
    %148 = vector.broadcast %cst_49 : f32 to vector<8x1xf32>
    %149 = arith.addf %145, %148 : vector<8x1xf32>
    %150 = math.rsqrt %149 : vector<8x1xf32>
    %151 = vector.broadcast %150 : vector<8x1xf32> to vector<8x32xf32>
    %152 = arith.mulf %147, %151 : vector<8x32xf32>
    %153 = vector.broadcast %133 : vector<1x32xf32> to vector<8x32xf32>
    %154 = arith.mulf %152, %153 : vector<8x32xf32>
    %155 = vector.broadcast %134 : vector<1x32xf32> to vector<8x32xf32>
    %156 = arith.addf %154, %155 : vector<8x32xf32>
    %157 = arith.truncf %156 : vector<8x32xf32> to vector<8x32xbf16>
    %c0_50 = arith.constant 0 : index
    %c0_51 = arith.constant 0 : index
    %158 = vector.load %arg10[%c0_50, %c0_51] : memref<32x128xbf16, #tpu.memory_space<vmem>>, vector<32x128xbf16>
    %cst_52 = arith.constant dense<0.000000e+00> : vector<8x128xf32>
    %159 = tpu.matmul %157, %158, %cst_52 {dimension_numbers = #tpu.dot_dimension_numbers<[1], [0], [0], [1], [0, 0, 1, 1], [], []>} : vector<8x32xbf16>, vector<32x128xbf16>, vector<8x128xf32> -> vector<8x128xf32>
    %c0_53 = arith.constant 0 : index
    %c0_54 = arith.constant 0 : index
    %160 = vector.load %arg11[%c0_53, %c0_54] : memref<1x128xf32, #tpu.memory_space<vmem>>, vector<1x128xf32>
    %161 = vector.broadcast %160 : vector<1x128xf32> to vector<8x128xf32>
    %162 = arith.addf %159, %161 : vector<8x128xf32>
    %cst_55 = arith.constant 0.000000e+00 : f32
    %163 = vector.broadcast %cst_55 : f32 to vector<8x128xf32>
    %164 = arith.maximumf %162, %163 : vector<8x128xf32>
    %165 = arith.truncf %164 : vector<8x128xf32> to vector<8x128xbf16>
    %c0_56 = arith.constant 0 : index
    %c0_57 = arith.constant 0 : index
    %166 = vector.load %arg12[%c0_56, %c0_57] : memref<128x32xbf16, #tpu.memory_space<vmem>>, vector<128x32xbf16>
    %cst_58 = arith.constant dense<0.000000e+00> : vector<8x32xf32>
    %167 = tpu.matmul %165, %166, %cst_58 {dimension_numbers = #tpu.dot_dimension_numbers<[1], [0], [0], [1], [0, 0, 1, 1], [], []>} : vector<8x128xbf16>, vector<128x32xbf16>, vector<8x32xf32> -> vector<8x32xf32>
    %c0_59 = arith.constant 0 : index
    %c0_60 = arith.constant 0 : index
    %168 = vector.load %arg13[%c0_59, %c0_60] : memref<1x32xf32, #tpu.memory_space<vmem>>, vector<1x32xf32>
    %169 = vector.broadcast %168 : vector<1x32xf32> to vector<8x32xf32>
    %170 = arith.addf %167, %169 : vector<8x32xf32>
    %171 = arith.addf %132, %170 : vector<8x32xf32>
    %c0_61 = arith.constant 0 : index
    %c0_62 = arith.constant 0 : index
    %172 = vector.load %arg14[%c0_61, %c0_62] : memref<8x32xf32, #tpu.memory_space<vmem>>, vector<8x32xf32>
    tpu.vector_store %arg14[%c0_61, %c0_62], %171 {strides = array<i32>} : memref<8x32xf32, #tpu.memory_space<vmem>>, vector<8x32xf32>,
    return
  }
  func.func @transform_0(%arg0: i32) -> (i32, i32) {
    %c0_i32 = arith.constant 0 : i32
    %c0_i32_0 = arith.constant 0 : i32
    return %arg0, %c0_i32 : i32, i32
  }
  func.func @transform_1(%arg0: i32) -> (i32, i32) {
    %c0_i32 = arith.constant 0 : i32
    %c0_i32_0 = arith.constant 0 : i32
    %c0_i32_1 = arith.constant 0 : i32
    return %c0_i32, %c0_i32_0 : i32, i32
  }
  func.func @transform_2(%arg0: i32) -> (i32, i32) {
    %c0_i32 = arith.constant 0 : i32
    %c0_i32_0 = arith.constant 0 : i32
    %c0_i32_1 = arith.constant 0 : i32
    return %c0_i32, %c0_i32_0 : i32, i32
  }
  func.func @transform_3(%arg0: i32) -> (i32, i32) {
    %c0_i32 = arith.constant 0 : i32
    %c0_i32_0 = arith.constant 0 : i32
    %c0_i32_1 = arith.constant 0 : i32
    return %c0_i32, %c0_i32_0 : i32, i32
  }
  func.func @transform_4(%arg0: i32) -> (i32, i32) {
    %c0_i32 = arith.constant 0 : i32
    %c0_i32_0 = arith.constant 0 : i32
    %c0_i32_1 = arith.constant 0 : i32
    return %c0_i32, %c0_i32_0 : i32, i32
  }
  func.func @transform_5(%arg0: i32) -> (i32, i32) {
    %c0_i32 = arith.constant 0 : i32
    %c0_i32_0 = arith.constant 0 : i32
    %c0_i32_1 = arith.constant 0 : i32
    return %c0_i32, %c0_i32_0 : i32, i32
  }
  func.func @transform_6(%arg0: i32) -> (i32, i32) {
    %c0_i32 = arith.constant 0 : i32
    %c0_i32_0 = arith.constant 0 : i32
    %c0_i32_1 = arith.constant 0 : i32
    return %c0_i32, %c0_i32_0 : i32, i32
  }
  func.func @transform_7(%arg0: i32) -> (i32, i32) {
    %c0_i32 = arith.constant 0 : i32
    %c0_i32_0 = arith.constant 0 : i32
    %c0_i32_1 = arith.constant 0 : i32
    return %c0_i32, %c0_i32_0 : i32, i32
  }
  func.func @transform_8(%arg0: i32) -> (i32, i32) {
    %c0_i32 = arith.constant 0 : i32
    %c0_i32_0 = arith.constant 0 : i32
    %c0_i32_1 = arith.constant 0 : i32
    return %c0_i32, %c0_i32_0 : i32, i32
  }
  func.func @transform_9(%arg0: i32) -> (i32, i32) {
    %c0_i32 = arith.constant 0 : i32
    %c0_i32_0 = arith.constant 0 : i32
    %c0_i32_1 = arith.constant 0 : i32
    return %c0_i32, %c0_i32_0 : i32, i32
  }
  func.func @transform_10(%arg0: i32) -> (i32, i32) {
    %c0_i32 = arith.constant 0 : i32
    %c0_i32_0 = arith.constant 0 : i32
    %c0_i32_1 = arith.constant 0 : i32
    return %c0_i32, %c0_i32_0 : i32, i32
  }
  func.func @transform_11(%arg0: i32) -> (i32, i32) {
    %c0_i32 = arith.constant 0 : i32
    %c0_i32_0 = arith.constant 0 : i32
    %c0_i32_1 = arith.constant 0 : i32
    return %c0_i32, %c0_i32_0 : i32, i32
  }
  func.func @transform_12(%arg0: i32) -> (i32, i32) {
    %c0_i32 = arith.constant 0 : i32
    %c0_i32_0 = arith.constant 0 : i32
    %c0_i32_1 = arith.constant 0 : i32
    return %c0_i32, %c0_i32_0 : i32, i32
  }
  func.func @transform_13(%arg0: i32) -> (i32, i32) {
    %c0_i32 = arith.constant 0 : i32
    %c0_i32_0 = arith.constant 0 : i32
    return %arg0, %c0_i32 : i32, i32
  }
}

</mosaic_0001>

<bundles_post_ra>
// kernel: tpu_custom_call.1
= control target key start
LH: loop header
LB: loop body
LE: loop exit
PB: predicated region body
PF: predicated region fallthrough
CT: control target
= control target key end

     0   :  { %s2179_s0 = inlined_call_operand.vmem [shape: f32[16,32], index: 0, kind: input, shape index: {}]   ;;  %s2180_s1 = inlined_call_operand.vmem [shape: f32[8,8], index: 1, kind: input, shape index: {}]   ;;  %s2181_s2 = inlined_call_operand.vmem [shape: f32[1,32], index: 2, kind: input, shape index: {}]   ;;  %s2182_s3 = inlined_call_operand.vmem [shape: f32[1,32], index: 3, kind: input, shape index: {}]   ;;  %s2183_s4 = inlined_call_operand.vmem [shape: bf16[32,96], index: 4, kind: input, shape index: {}]   ;;  %s2184_s5 = inlined_call_operand.vmem [shape: bf16[32,32], index: 5, kind: input, shape index: {}]   ;;  %s2185_s6 = inlined_call_operand.vmem [shape: f32[1,32], index: 6, kind: input, shape index: {}]   ;;  %s2186_s7 = inlined_call_operand.vmem [shape: f32[1,32], index: 7, kind: input, shape index: {}]   ;;  %s2187_s8 = inlined_call_operand.vmem [shape: f32[1,32], index: 8, kind: input, shape index: {}]   ;;  %s2188_s9 = inlined_call_operand.vmem [shape: bf16[32,128], index: 9, kind: input, shape index: {}]   ;;  %s2189_s10 = inlined_call_operand.vmem [shape: f32[1,128], index: 10, kind: input, shape index: {}]   ;;  %s2190_s11 = inlined_call_operand.vmem [shape: bf16[128,32], index: 11, kind: input, shape index: {}]   ;;  %s2191_s12 = inlined_call_operand.vmem [shape: f32[1,32], index: 12, kind: input, shape index: {}]   ;;  %s2192_s13 = inlined_call_operand.hbm [shape: f32[16,32], index: 13, kind: output, shape index: {}]  }
   0x1   :  { %2193 = sst [smem:[#allocation5_spill]] %s2179_s0 }
   0x2   :  { %2194 = sst [smem:[#allocation6_spill]] %s2180_s1 }
   0x3   :  { %2195 = sst [smem:[#allocation7_spill]] %s2181_s2 }
   0x4   :  { %18 = vsyncpa [#allocation3], 0 }
   0x5   :  { %20 = vsyncpa [#allocation3 + $0x1], 0  ;;  %s1881_s25 = smov 0   ;;  %s1883_s26 = smov 0  }
   0x6   :  { %s1885_s27 = smov 0   ;;  %s1887_s28 = smov 0  }
   0x7 LB: > { %s1902_s29 = sadd.s32 4294967295, %s1795_s28   ;;  %s1459_s30 = sadd.s32 4294967294, %s1795_s28   ;;  %s1795_s28 = sphi %s1887_s28, %s2204_s28   ;;  %s1791_s27 = sphi %s1885_s27, %s2203_s27   ;;  %s1787_s26 = sphi %s1883_s26, %s2202_s26   ;;  %s1783_s25 = sphi %s1881_s25, %s2201_s25  }
   0x8   : > { %s1906_s14 = sadd.s32 1, %s1795_s28   ;;  %s311_s15 = sadd.s32 1, %s1791_s27 }
   0x9   : > { %s308_s16 = ssub.s32 %s1795_s28, %s1906_s14  ;;  %p321_p0 = scmp.ne.s32.totalorder %s1791_s27, %s1787_s26 }
   0xa   : > { %p309_p1 = scmp.eq.s32.totalorder %s308_s16, 0  ;;  %p322_p2 = scmp.eq.s32.totalorder %s1902_s29, 1 }
   0xb   : > { %p327_p3 = scmp.ne.s32.totalorder %s1787_s26, %s1783_s25  ;;  %p328_p4 = scmp.eq.s32.totalorder %s1459_s30, 1 }
   0xc   : > { %s1917_s17 = scalar_select %p309_p1, %s1791_s27, %s311_s15  }
   0xd   : > { %p1919_p5 = por %p322_p2, %p321_p0  ;;  %p1923_p6 = por %p328_p4, %p327_p3 }
   0xe   : > { %p1462_p7 = scmp.ge.s32.totalorder %s1795_s28, 1  ;;  %p389_p8 = scmp.lt.s32.totalorder %s1795_s28, 3 }
  0x10   : > { %p390_p9 = pnand %p1462_p7, %p389_p8 }
  0x11   : > { %p432_p10 = scmp.lt.s32.totalorder (!%p390_p9), %s1902_s29, 1  ;;  %vm440_vm0 = vcmask (!%p390_p9), 261120   ;;  %s2198_s0 = sld [smem:[#allocation5_spill]] (!%p390_p9)  ;;  %v1701_v7 = vld [vmem:[%s2183_s4] sm:$0xff] (!%p390_p9)   ;;  %v1797_v8 = vmov (!%p390_p9), 0.0   ;;  %vm1798_vm1 = vmmov (!%p390_p9), 0  }
  0x12   : > { %393 = sbr.rel (%p390_p9) target bundleno = 4235 (0x108b), region = 72  ;;  %1541 = vmatprep.subr.bf16.mxu1 (!%p390_p9), %v1797_v8  ;;  %1545 = vmatprep.mubr.msk.bf16.mxu1 (!%p390_p9), %vm1798_vm1, %v1797_v8  ;;  %v1702_v9 = vld [vmem:[%s2183_s4 + $0x8] sm:$0xff] (!%p390_p9)   ;;  %s2199_s2 = sld [smem:[#allocation7_spill]] (!%p390_p9)  ;;  %v1466_v16 = vld [vmem:[%s2182_s3] ss:$0 sm:$0xff] (!%p390_p9)  ;;  %vm534_vm2 = vcmask (!%p390_p9), 64512  }
  0x13   : > { %1542 = vmatpush3.bf16.msra.mxu1 (!%p390_p9), %v1701_v7  ;;  %1567 = vmatprep.subr.bf16.mxu0 (!%p390_p9), %v1797_v8  ;;  %s1799_s30 = smov (!%p390_p9), 64   ;;  %s1800_s15 = smov (!%p390_p9), 96   ;;  %vm598_vm3 = vcmask (!%p390_p9), 1043456  }
  0x14   : > { %1543 = vmatprep.subr.bf16.mxu1 (!%p390_p9), %v1797_v8  ;;  %1569 = vmatprep.mubr.msk.bf16.mxu0 (!%p390_p9), %vm1798_vm1, %v1797_v8  ;;  %s2200_s1 = sld [smem:[#allocation6_spill]] (!%p390_p9)  ;;  %s1802_s22 = smov (!%p390_p9), 120  }
  0x15   : > { %s1803_s23 = smov (!%p390_p9), 56   ;;  %s1809_s16 = smov (!%p390_p9), 40  }
  0x17   : > { %1544 = vmatpush3.bf16.msra.mxu1 (!%p390_p9), %v1702_v9 }
  0x18   : > { %1549 = vmatprep.subr.bf16.mxu1 (!%p390_p9), %v1797_v8  ;;  %v1465_v14 = vld [vmem:[%s2199_s2] ss:$0 sm:$0xff] (!%p390_p9) }
  0x19   : > { %s433_s20 = scalar_select %p432_p10, %s1902_s29, 1 }
  0x1a   : > { %v1978_v29 = vld [vmem:[%s2200_s1] sm:$0xff] }
  0x1b   : > { %s1464_s21 = sshll.u32 %s433_s20, 3  ;;  %s1810_s20 = smov [#allocation2]  }
  0x1c   : > { %s435_s24 = scalar_lea.vmem %s2198_s0, %s1464_s21  ;;  %s1801_s21 = smov 88  }
  0x1d   : > { %v1934_v0 = vld [vmem:[%s435_s24] sm:$0xff]  ;;  %s1804_s24 = smov 80  }
  0x1e   : > { %v441_v1 = vsel %vm440_vm0, %v1934_v0, 0.0 }
  0x1f   : > { %442 = vadd.xlane.f32.xlu0 %v441_v1 }
  0xac   : > { %v443_v2 = vpop.xlane.xlu0 %442 }
  0xad   : > { %v445_v3 = vmul.f32 0.03125, %v443_v2  ;;  %v755_v2 = vld [vmem:[%s2184_s5 + $0x4] sm:$0xf] }
  0xaf   : > { %v446_v4 = vsub.f32 %v1934_v0, %v445_v3  ;;  %v760_v3 = vsel %vm598_vm3, %v755_v2, 0 }
  0xb1   : > { %v447_v5 = vmul.f32 %v446_v4, %v446_v4 }
  0xb3   : > { %v448_v6 = vsel %vm440_vm0, %v447_v5, 0.0 }
  0xb4   : > { %449 = vadd.xlane.f32.xlu0 %v448_v6  ;;  %v643_v6 = vld [vmem:[%s2184_s5] sm:$0xf] }
 0x141   : > { %v450_v10 = vpop.xlane.xlu0 %449 }
 0x142   : > { %v451_v11 = vmul.f32 0.03125, %v450_v10  ;;  %v806_v10 = vsel %vm598_vm3, %v643_v6, 0 }
 0x144   : > { %v452_v12 = vadd.f32 1e-05, %v451_v11 }
 0x146   : > { %1713 = vrsqrt.f32 %v452_v12 }
 0x150   : > { %v1714_v13 = vpop.eup %1713 }
 0x151   : > { %v454_v15 = vmul.f32 %v1714_v13, %v446_v4 }
 0x153   : > { %v461_v17 = vmul.f32 %v1465_v14, %v454_v15 }
 0x155   : > { %v468_v18 = vadd.f32 %v1466_v16, %v461_v17 }
 0x157   : > { %v469_v19 = vpack.c.bf16 %v468_v18, %v468_v18 }
 0x159   : > { %1546 = vmatmul.mubr.msk.bf16.vlgmr.msra.gmra.mrb[0].mxu1 %vm440_vm0, %v469_v19 }
 0x15a   : > { %1551 = vmatprep.mubr.msk.bf16.mxu1 %vm1798_vm1, %v1797_v8 }
 0x22c   : > { %v523_v20 = vpop.f32.mrb[0].mxu1 }
 0x22d   : > { %v1963_v21 = vpack.c.bf16 %v523_v20, %v523_v20  ;;  %v1547_v22 = vpop.f32.mrb[1].mxu1 }
 0x22e   : > { %v526_v23 = vpop.f32.mrb[2].mxu1 }
 0x22f   : > { %593 = vrot.lane.b32.xlu0 %v1963_v21, %s1799_s30  ;;  %532 = vrot.lane.b32.xlu1 %v1963_v21, %s1800_s15  ;;  %v1548_v24 = vpop.f32.mrb[3].mxu1  ;;  %s1805_s30 = smov 112   ;;  %s1806_s15 = smov 48  }
 0x2a1   : > { %v533_v25 = vpop.permute.xlu1 %532  ;;  %v594_v27 = vpop.permute.xlu0 %593 }
 0x2a2   : > { %v539_v26 = vsel %vm534_vm2, %v533_v25, 0  ;;  %v600_v28 = vsel %vm598_vm3, %v594_v27, 0 }
 0x2a3   : > { %1550 = vmatpush3.bf16.xpose.msra.mxu1 %v539_v26 }
 0x2a4   : > { %1555 = vmatprep.subr.bf16.mxu1 %v1797_v8 }
 0x2aa   : > { %1552 = vmatmul.mubr.msk.bf16.vlgmr.msra.gmra.mrb[4].mxu1 %vm534_vm2, %v1963_v21 }
 0x2ab   : > { %1556 = vmatpush3.bf16.msra.mxu1 %v600_v28  ;;  %1557 = vmatprep.mubr.msk.bf16.mxu1 %vm1798_vm1, %v1797_v8 }
 0x2ac   : > { %1561 = vmatprep.subr.bf16.mxu1 %v1797_v8 }
 0x37d   : > { %v575_v30 = vpop.f32.mrb[4].mxu1 }
 0x37e   : > { %v576_v31 = vadd.f32 %v575_v30, %v1978_v29  ;;  %v1553_v32 = vpop.f32.mrb[5].mxu1 }
 0x37f   : > { %v578_v33 = vpop.f32.mrb[6].mxu1 }
 0x380   : > { %v1554_v34 = vpop.f32.mrb[7].mxu1  ;;  %v581_v35 = vsel %vm534_vm2, %v576_v31, -inf }
 0x381   : > { %582 = vmax.xlane.f32.xlu1 %v581_v35 }
 0x40e   : > { %v583_v36 = vpop.xlane.xlu1 %582 }
 0x40f   : > { %v584_v37 = vsub.f32 %v576_v31, %v583_v36 }
 0x411   : > { %v585_v38 = vmul.f32 1.442695, %v584_v37 }
 0x413   : > { %1715 = vpow2.f32 %v585_v38 }
 0x41d   : > { %v1716_v39 = vpop.eup %1715 }
 0x41e   : > { %v587_v40 = vsel %vm534_vm2, %v1716_v39, 0.0 }
 0x41f   : > { %588 = vadd.xlane.f32.xlu0 %v587_v40 }
 0x435   : > { %646 = vrot.lane.b32.xlu0 %v1963_v21, %s1801_s21  ;;  %s1737_s21 = sshll.u32 %s1810_s20, 4  ;;  %s1738_s21 = int_to_ptr.vmem [resolvable:$false] %s1737_s21 }
 0x436   : > { %s1739_s2 = scalar_lea.vmem %s1738_s21, 256 }
 0x439   : > { %644 = vrot.lane.b32.xlu0 %v1963_v21, %s1802_s22  ;;  %s1499_s22 = sshll.u32 %s1902_s29, 7 }
 0x43a   : > { %s2136_s1 = scalar_lea.hbm %s2192_s13, %s1499_s22 }
 0x4ac   : > { %v589_v41 = vpop.xlane.xlu0 %588 }
 0x4ad   : > { %1717 = vrcp.f32 %v589_v41 }
 0x4b0   : > { %v647_v44 = vpop.permute.xlu0 %646 }
 0x4b1   : > { %v652_v46 = vsel %vm534_vm2, %v647_v44, 0 }
 0x4b4   : > { %v645_v47 = vpop.permute.xlu0 %644 }
 0x4b7   : > { %v1718_v42 = vpop.eup %1717 }
 0x4b8   : > { %v591_v43 = vmul.f32 %v1718_v42, %v1716_v39 }
 0x4ba   : > { %v592_v45 = vpack.c.bf16 %v591_v43, %v591_v43 }
 0x4bc   : > { %1558 = vmatmul.mubr.msk.bf16.vlgmr.msra.gmra.mrb[8].mxu1 %vm534_vm2, %v592_v45 }
 0x4bd   : > { %1562 = vmatpush3.bf16.xpose.msra.mxu1 %v652_v46  ;;  %1563 = vmatprep.mubr.msk.bf16.mxu1 %vm1798_vm1, %v1797_v8 }
 0x4be   : > { %1573 = vmatprep.subr.bf16.mxu1 %v1797_v8 }
 0x4c4   : > { %1564 = vmatmul.mubr.msk.bf16.vlgmr.msra.gmra.mrb[12].mxu1 %vm534_vm2, %v645_v47 }
 0x4c5   : > { %1575 = vmatprep.mubr.msk.bf16.mxu1 %vm1798_vm1, %v1797_v8  ;;  %1574 = vmatpush3.bf16.msra.mxu1 %v760_v3 }
 0x4c6   : > { %1585 = vmatprep.subr.bf16.mxu1 %v1797_v8 }
 0x58f   : > { %v636_v48 = vpop.f32.mrb[8].mxu1 }
 0x590   : > { %v1559_v49 = vpop.f32.mrb[9].mxu1  ;;  %v642_v12 = vpack.c.bf16 %v636_v48, %v636_v48 }
 0x591   : > { %v639_v50 = vpop.f32.mrb[10].mxu1 }
 0x592   : > { %v1560_v51 = vpop.f32.mrb[11].mxu1 }
 0x593   : > { %v959_v51 = vld [vmem:[%s2184_s5 + $0x8] sm:$0xf] }
 0x597   : > { %v688_v52 = vpop.f32.mrb[12].mxu1 }
 0x598   : > { %v689_v53 = vadd.f32 %v688_v52, %v1978_v29  ;;  %v1565_v54 = vpop.f32.mrb[13].mxu1  ;;  %v964_v52 = vsel %vm598_vm3, %v959_v51, 0 }
 0x599   : > { %v691_v55 = vpop.f32.mrb[14].mxu1 }
 0x59a   : > { %v1566_v56 = vpop.f32.mrb[15].mxu1  ;;  %v694_v57 = vsel %vm534_vm2, %v689_v53, -inf }
 0x59b   : > { %695 = vmax.xlane.f32.xlu1 %v694_v57 }
 0x5ac   : > { %706 = vrot.lane.b32.xlu1 %v1963_v21, %s1803_s23  ;;  %s1807_s23 = smov 72  }
 0x5b0   : > { %850 = vrot.lane.b32.xlu1 %v1963_v21, %s1804_s24  ;;  %s1808_s24 = smov 104  }
 0x5b4   : > { %848 = vrot.lane.b32.xlu1 %v1963_v21, %s1805_s30 }
 0x628   : > { %v696_v58 = vpop.xlane.xlu1 %695 }
 0x629   : > { %v697_v59 = vsub.f32 %v689_v53, %v696_v58 }
 0x62b   : > { %v698_v60 = vmul.f32 1.442695, %v697_v59 }
 0x62c   : > { %v707_v61 = vpop.permute.xlu1 %706 }
 0x62d   : > { %1719 = vpow2.f32 %v698_v60  ;;  %v712_v62 = vsel %vm598_vm3, %v707_v61, 0 }
 0x62e   : > { %1568 = vmatpush3.bf16.msra.mxu0 %v712_v62 }
 0x62f   : > { %1579 = vmatprep.subr.bf16.mxu0 %v1797_v8 }
 0x630   : > { %v851_v14 = vpop.permute.xlu1 %850 }
 0x631   : > { %v856_v19 = vsel %vm534_vm2, %v851_v14, 0 }
 0x634   : > { %v849_v24 = vpop.permute.xlu1 %848 }
 0x637   : > { %v1720_v63 = vpop.eup %1719 }
 0x638   : > { %v700_v1 = vsel %vm534_vm2, %v1720_v63, 0.0 }
 0x639   : > { %701 = vadd.xlane.f32.xlu0 %v700_v1 }
 0x64f   : > { %910 = vrot.lane.b32.xlu0 %v1963_v21, %s1806_s15  ;;  %s429_s15 = sand.u32 1, %s1787_s26  }
 0x650   : > { %s1387_s29 = scalar_lea.sflag [#allocation3], %s429_s15 }
 0x6c6   : > { %v702_v4 = vpop.xlane.xlu0 %701 }
 0x6c7   : > { %1721 = vrcp.f32 %v702_v4 }
 0x6ca   : > { %v911_v11 = vpop.permute.xlu0 %910 }
 0x6cb   : > { %v916_v13 = vsel %vm598_vm3, %v911_v11, 0 }
 0x6d1   : > { %v1722_v5 = vpop.eup %1721 }
 0x6d2   : > { %v704_v7 = vmul.f32 %v1722_v5, %v1720_v63 }
 0x6d4   : > { %v705_v9 = vpack.c.bf16 %v704_v7, %v704_v7  ;;  %v1118_v7 = vld [vmem:[%s2184_s5 + $0xc] sm:$0xf] }
 0x6d6   : > { %1570 = vmatmul.mubr.msk.bf16.vlgmr.msra.gmra.mrb[0].mxu0 %vm534_vm2, %v705_v9 }
 0x6d7   : > { %1580 = vmatpush3.bf16.msra.mxu0 %v806_v10  ;;  %1581 = vmatprep.mubr.msk.bf16.mxu0 %vm1798_vm1, %v1797_v8 }
 0x6d8   : > { %1591 = vmatprep.subr.bf16.mxu0 %v1797_v8 }
 0x6de   : > { %1582 = vmatmul.mubr.msk.bf16.vlgmr.msra.gmra.mrb[4].mxu0 %vm534_vm2, %v642_v12 }
 0x6df   : > { %1592 = vmatpush3.bf16.msra.mxu0 %v916_v13  ;;  %1593 = vmatprep.mubr.msk.bf16.mxu0 %vm1798_vm1, %v1797_v8 }
 0x6e0   : > { %1603 = vmatprep.subr.bf16.mxu0 %v1797_v8 }
 0x7a9   : > { %v748_v15 = vpop.f32.mrb[0].mxu0 }
 0x7aa   : > { %v754_v16 = vpack.c.bf16 %v748_v15, %v748_v15  ;;  %v1571_v17 = vpop.f32.mrb[1].mxu0 }
 0x7ab   : > { %v751_v18 = vpop.f32.mrb[2].mxu0 }
 0x7ac   : > { %v1572_v20 = vpop.f32.mrb[3].mxu0  ;;  %1576 = vmatmul.mubr.msk.bf16.vlgmr.msra.gmra.mrb[16].mxu1 %vm534_vm2, %v754_v16 }
 0x7ad   : > { %1586 = vmatpush3.bf16.xpose.msra.mxu1 %v856_v19  ;;  %1587 = vmatprep.mubr.msk.bf16.mxu1 %vm1798_vm1, %v1797_v8 }
 0x7ae   : > { %1597 = vmatprep.subr.bf16.mxu1 %v1797_v8 }
 0x7b1   : > { %v842_v22 = vpop.f32.mrb[4].mxu0 }
 0x7b2   : > { %v1583_v23 = vpop.f32.mrb[5].mxu0 }
 0x7b3   : > { %v845_v25 = vpop.f32.mrb[6].mxu0 }
 0x7b4   : > { %v1584_v26 = vpop.f32.mrb[7].mxu0  ;;  %1588 = vmatmul.mubr.msk.bf16.vlgmr.msra.gmra.mrb[20].mxu1 %vm534_vm2, %v849_v24 }
 0x7b5   : > { %1599 = vmatprep.mubr.msk.bf16.mxu1 %vm1798_vm1, %v1797_v8  ;;  %1598 = vmatpush3.bf16.msra.mxu1 %v964_v52  ;;  %v1484_v52 = vld [vmem:[%s2187_s8] ss:$0 sm:$0xff] }
 0x7b6   : > { %1609 = vmatprep.subr.bf16.mxu1 %v1797_v8 }
 0x87f   : > { %v796_v27 = vpop.f32.mrb[16].mxu1 }
 0x880   : > { %v2028_v28 = vadd.f32 %v842_v22, %v796_v27  ;;  %v1577_v30 = vpop.f32.mrb[17].mxu1  ;;  %v1482_v27 = vld [vmem:[%s2185_s6] ss:$0 sm:$0xff] }
 0x881   : > { %v799_v31 = vpop.f32.mrb[18].mxu1 }
 0x882   : > { %v1578_v32 = vpop.f32.mrb[19].mxu1 }
 0x887   : > { %v892_v33 = vpop.f32.mrb[20].mxu1 }
 0x888   : > { %v893_v34 = vadd.f32 %v892_v33, %v1978_v29  ;;  %v1589_v35 = vpop.f32.mrb[21].mxu1 }
 0x889   : > { %v895_v36 = vpop.f32.mrb[22].mxu1 }
 0x88a   : > { %v1590_v37 = vpop.f32.mrb[23].mxu1  ;;  %v898_v38 = vsel %vm534_vm2, %v893_v34, -inf }
 0x88b   : > { %899 = vmax.xlane.f32.xlu1 %v898_v38 }
 0x918   : > { %v900_v39 = vpop.xlane.xlu1 %899 }
 0x919   : > { %v901_v40 = vsub.f32 %v893_v34, %v900_v39  ;;  %v1703_v39 = vld [vmem:[%s2188_s9] sm:$0xff]  }
 0x91b   : > { %v902_v41 = vmul.f32 1.442695, %v901_v40  ;;  %v1705_v40 = vld [vmem:[%s2190_s11] sm:$0xff]  }
 0x91d   : > { %1723 = vpow2.f32 %v902_v41  ;;  %v1706_v41 = vld [vmem:[%s2190_s11 + $0x8] sm:$0xff]  }
 0x927   : > { %v1724_v42 = vpop.eup %1723 }
 0x928   : > { %v904_v43 = vsel %vm534_vm2, %v1724_v42, 0.0 }
 0x929   : > { %905 = vadd.xlane.f32.xlu0 %v904_v43  ;;  %v1708_v43 = vld [vmem:[%s2190_s11 + $0x18] sm:$0xff]  }
 0x93f   : > { %1009 = vrot.lane.b32.xlu0 %v1963_v21, %s1807_s23 }
 0x943   : > { %1007 = vrot.lane.b32.xlu0 %v1963_v21, %s1808_s24 }
 0x9b6   : > { %v906_v44 = vpop.xlane.xlu0 %905 }
 0x9b7   : > { %1725 = vrcp.f32 %v906_v44  ;;  %v1709_v44 = vld [vmem:[%s2190_s11 + $0x20] sm:$0xff]  }
 0x9ba   : > { %v1010_v47 = vpop.permute.xlu0 %1009 }
 0x9bb   : > { %v1015_v49 = vsel %vm534_vm2, %v1010_v47, 0 }
 0x9be   : > { %v1008_v50 = vpop.permute.xlu0 %1007 }
 0x9c1   : > { %v1726_v45 = vpop.eup %1725 }
 0x9c2   : > { %v908_v46 = vmul.f32 %v1726_v45, %v1724_v42  ;;  %v1707_v42 = vld [vmem:[%s2190_s11 + $0x10] sm:$0xff]   ;;  %v1710_v45 = vld [vmem:[%s2190_s11 + $0x28] sm:$0xff]  }
 0x9c4   : > { %v909_v48 = vpack.c.bf16 %v908_v46, %v908_v46 }
 0x9c6   : > { %1594 = vmatmul.mubr.msk.bf16.vlgmr.msra.gmra.mrb[8].mxu0 %vm534_vm2, %v909_v48 }
 0x9c7   : > { %1604 = vmatpush3.bf16.xpose.msra.mxu0 %v1015_v49  ;;  %1605 = vmatprep.mubr.msk.bf16.mxu0 %vm1798_vm1, %v1797_v8 }
 0x9c8   : > { %1615 = vmatprep.subr.bf16.mxu0 %v1797_v8 }
 0x9ce   : > { %1606 = vmatmul.mubr.msk.bf16.vlgmr.msra.gmra.mrb[12].mxu0 %vm534_vm2, %v1008_v50  ;;  %v1483_v50 = vld [vmem:[%s2186_s7] ss:$0 sm:$0xff] }
 0x9cf   : > { %1617 = vmatprep.mubr.msk.bf16.mxu0 %vm1798_vm1, %v1797_v8 }
 0xa99   : > { %v952_v53 = vpop.f32.mrb[8].mxu0 }
 0xa9a   : > { %v958_v54 = vpack.c.bf16 %v952_v53, %v952_v53  ;;  %v1595_v55 = vpop.f32.mrb[9].mxu0 }
 0xa9b   : > { %v955_v56 = vpop.f32.mrb[10].mxu0 }
 0xa9c   : > { %v1596_v57 = vpop.f32.mrb[11].mxu0  ;;  %1600 = vmatmul.mubr.msk.bf16.vlgmr.msra.gmra.mrb[24].mxu1 %vm534_vm2, %v958_v54  ;;  %v1711_v56 = vld [vmem:[%s2190_s11 + $0x30] sm:$0xff]  }
 0xa9d   : > { %1611 = vmatprep.mubr.msk.bf16.mxu1 %vm1798_vm1, %v1797_v8  ;;  %v1712_v57 = vld [vmem:[%s2190_s11 + $0x38] sm:$0xff]  }
 0xaa1   : > { %v1051_v58 = vpop.f32.mrb[12].mxu0 }
 0xaa2   : > { %v1052_v59 = vadd.f32 %v1051_v58, %v1978_v29  ;;  %v1607_v60 = vpop.f32.mrb[13].mxu0  ;;  %v1485_v58 = vld [vmem:[%s2189_s10] ss:$0 sm:$0xff] }
 0xaa3   : > { %v1054_v61 = vpop.f32.mrb[14].mxu0 }
 0xaa4   : > { %v1608_v62 = vpop.f32.mrb[15].mxu0  ;;  %v1057_v63 = vsel %vm534_vm2, %v1052_v59, -inf }
 0xaa5   : > { %1058 = vmax.xlane.f32.xlu1 %v1057_v63 }
 0xab6   : > { %1069 = vrot.lane.b32.xlu1 %v1963_v21, %s1809_s16  ;;  %v1123_v21 = vsel %vm598_vm3, %v1118_v7, 0  ;;  %s1463_s16 = sshll.u32 %s429_s15, 3 }
 0xab7   : > { %1616 = vmatpush3.bf16.msra.mxu0 %v1123_v21  ;;  %s431_s23 = scalar_lea.vmem [#allocation2], %s1463_s16 }
 0xab8   : > { %1629 = vmatprep.subr.bf16.mxu0 %v1797_v8  ;;  %s1400_s24 = sshll.u32 %s431_s23, 4  ;;  %s2138_s24 = int_to_ptr.vmem [resolvable:$true] %s1400_s24 }
 0xab9   : > { %s1733_s16 = scalar_lea.vmem %s2138_s24, 128  ;;  %p1740_p0 = scmp.lt.s32.totalorder %s2138_s24, %s1738_s21 }
 0xaba   : > { %p1734_p11 = scmp.ne.s32.totalorder %s2138_s24, %s1733_s16  ;;  %p1741_p1 = scmp.lt.s32.totalorder %s1739_s2, %s1733_s16 }
 0xabc   : > { %p1735_p12 = pnand %p1734_p11, %p1919_p5  ;;  %p1742_p2 = por %p1741_p1, %p1740_p0 }
 0xabe   : > { %p1736_p13 = pneg %p1735_p12 }
 0xac0   : > { %p1743_p3 = pnand %p1742_p2, %p1736_p13 }
 0xb32   : > { %v1059_v1 = vpop.xlane.xlu1 %1058 }
 0xb33   : > { %v1060_v2 = vsub.f32 %v1052_v59, %v1059_v1 }
 0xb35   : > { %v1061_v3 = vmul.f32 1.442695, %v1060_v2 }
 0xb36   : > { %v1070_v4 = vpop.permute.xlu1 %1069 }
 0xb37   : > { %1727 = vpow2.f32 %v1061_v3  ;;  %v1075_v5 = vsel %vm598_vm3, %v1070_v4, 0 }
 0xb38   : > { %1610 = vmatpush3.bf16.msra.mxu1 %v1075_v5 }
 0xb39   : > { %1621 = vmatprep.subr.bf16.mxu1 %v1797_v8 }
 0xb41   : > { %v1728_v29 = vpop.eup %1727 }
 0xb42   : > { %v1063_v6 = vsel %vm534_vm2, %v1728_v29, 0.0 }
 0xb43   : > { %1064 = vadd.xlane.f32.xlu0 %v1063_v6 }
 0xb6f   : > { %v1000_v9 = vpop.f32.mrb[24].mxu1 }
 0xb70   : > { %v1006_v10 = vadd.f32 %v1000_v9, %v2028_v28  ;;  %v1601_v11 = vpop.f32.mrb[25].mxu1 }
 0xb71   : > { %v1003_v12 = vpop.f32.mrb[26].mxu1 }
 0xb72   : > { %v1602_v13 = vpop.f32.mrb[27].mxu1 }
 0xbd0   : > { %v1065_v14 = vpop.xlane.xlu0 %1064 }
 0xbd1   : > { %1729 = vrcp.f32 %v1065_v14 }
 0xbdb   : > { %v1730_v15 = vpop.eup %1729 }
 0xbdc   : > { %v1067_v16 = vmul.f32 %v1730_v15, %v1728_v29 }
 0xbde   : > { %v1068_v17 = vpack.c.bf16 %v1067_v16, %v1067_v16 }
 0xbe0   : > { %1612 = vmatmul.mubr.msk.bf16.vlgmr.msra.gmra.mrb[28].mxu1 %vm534_vm2, %v1068_v17 }
 0xbe1   : > { %1625 = vmatprep.mubr.msk.bf16.mxu1 %vm1798_vm1, %v1797_v8  ;;  %1622 = vmatpush3.bf16.msra.mxu1 %v1703_v39 }
 0xbe2   : > { %1623 = vmatprep.subr.bf16.mxu1 %v1797_v8 }
 0xcb3   : > { %v1111_v18 = vpop.f32.mrb[28].mxu1 }
 0xcb4   : > { %v1117_v19 = vpack.c.bf16 %v1111_v18, %v1111_v18  ;;  %v1613_v20 = vpop.f32.mrb[29].mxu1 }
 0xcb5   : > { %v1114_v22 = vpop.f32.mrb[30].mxu1 }
 0xcb6   : > { %v1614_v23 = vpop.f32.mrb[31].mxu1  ;;  %1618 = vmatmul.mubr.msk.bf16.vlgmr.msra.gmra.mrb[16].mxu0 %vm534_vm2, %v1117_v19 }
 0xcb7   : > { %1645 = vmatprep.mubr.msk.bf16.mxu0 %vm1798_vm1, %v1797_v8  ;;  %1630 = vmatpush3.bf16.msra.mxu0 %v1705_v40 }
 0xcb8   : > { %1631 = vmatprep.subr.bf16.mxu0 %v1797_v8 }
 0xcbb   : > { %1632 = vmatpush3.bf16.msra.mxu0 %v1706_v41 }
 0xcbc   : > { %1633 = vmatprep.subr.bf16.mxu0 %v1797_v8 }
 0xcbf   : > { %1634 = vmatpush3.bf16.msra.mxu0 %v1707_v42 }
 0xcc0   : > { %1635 = vmatprep.subr.bf16.mxu0 %v1797_v8 }
 0xcc3   : > { %1636 = vmatpush3.bf16.msra.mxu0 %v1708_v43 }
 0xcc4   : > { %1637 = vmatprep.subr.bf16.mxu0 %v1797_v8 }
 0xcc7   : > { %1638 = vmatpush3.bf16.msra.mxu0 %v1709_v44 }
 0xcc8   : > { %1639 = vmatprep.subr.bf16.mxu0 %v1797_v8 }
 0xccb   : > { %1640 = vmatpush3.bf16.msra.mxu0 %v1710_v45 }
 0xccc   : > { %1641 = vmatprep.subr.bf16.mxu0 %v1797_v8 }
 0xccf   : > { %1642 = vmatpush3.bf16.msra.mxu0 %v1711_v56 }
 0xcd0   : > { %1643 = vmatprep.subr.bf16.mxu0 %v1797_v8  ;;  %v1489_v8 = vld [vmem:[%s2191_s12] ss:$0 sm:$0xff] }
 0xcd3   : > { %1644 = vmatpush3.bf16.msra.mxu0 %v1712_v57 }
 0xd89   : > { %v1159_v24 = vpop.f32.mrb[16].mxu0 }
 0xd8a   : > { %v1165_v25 = vadd.f32 %v1159_v24, %v1006_v10  ;;  %v1619_v26 = vpop.f32.mrb[17].mxu0 }
 0xd8b   : > { %v1162_v28 = vpop.f32.mrb[18].mxu0 }
 0xd8c   : > { %v1166_v30 = vadd.f32 %v1165_v25, %v1934_v0  ;;  %v1620_v31 = vpop.f32.mrb[19].mxu0  ;;  %v1704_v0 = vld [vmem:[%s2188_s9 + $0x8] sm:$0xff]  }
 0xd8d   : > { %1624 = vmatpush3.bf16.msra.mxu1 %v1704_v0 }
 0xd8e   : > { %v2073_v32 = vadd.f32 %v1482_v27, %v1166_v30 }
 0xd90   : > { %v1177_v33 = vsel %vm440_vm0, %v2073_v32, 0.0 }
 0xd91   : > { %1178 = vadd.xlane.f32.xlu1 %v1177_v33 }
 0xe1e   : > { %v1179_v34 = vpop.xlane.xlu1 %1178 }
 0xe1f   : > { %v1180_v35 = vmul.f32 0.03125, %v1179_v34 }
 0xe21   : > { %v1181_v36 = vsub.f32 %v2073_v32, %v1180_v35 }
 0xe23   : > { %v1182_v37 = vmul.f32 %v1181_v36, %v1181_v36 }
 0xe25   : > { %v1183_v38 = vsel %vm440_vm0, %v1182_v37, 0.0 }
 0xe26   : > { %1184 = vadd.xlane.f32.xlu0 %v1183_v38 }
 0xeb3   : > { %v1185_v46 = vpop.xlane.xlu0 %1184 }
 0xeb4   : > { %v1186_v47 = vmul.f32 0.03125, %v1185_v46 }
 0xeb6   : > { %v1187_v48 = vadd.f32 1e-05, %v1186_v47 }
 0xeb8   : > { %1731 = vrsqrt.f32 %v1187_v48 }
 0xec2   : > { %v1732_v49 = vpop.eup %1731 }
 0xec3   : > { %v1189_v51 = vmul.f32 %v1732_v49, %v1181_v36 }
 0xec5   : > { %v1196_v53 = vmul.f32 %v1483_v50, %v1189_v51 }
 0xec7   : > { %v1203_v54 = vadd.f32 %v1484_v52, %v1196_v53 }
 0xec9   : > { %v1204_v55 = vpack.c.bf16 %v1203_v54, %v1203_v54 }
 0xecb   : > { %1626 = vmatmul.mubr.msk.bf16.vlgmr.msra.gmra.mrb[32].mxu1 %vm440_vm0, %v1204_v55 }
 0xf9e   : > { %v1265_v59 = vpop.f32.mrb[32].mxu1 }
 0xf9f   : > { %v1266_v60 = vadd.f32 %v1485_v58, %v1265_v59  ;;  %v1627_v61 = vpop.f32.mrb[33].mxu1 }
 0xfa0   : > { %v1268_v62 = vpop.f32.mrb[34].mxu1 }
 0xfa1   : > { %v1271_v63 = vmax.f32 %v1266_v60, 0.0  ;;  %v1628_v1 = vpop.f32.mrb[35].mxu1 }
 0xfa3   : > { %v1272_v2 = vpack.c.bf16 %v1271_v63, %v1271_v63 }
 0xfa5   : > { %1646 = vmatmul.mubr.bf16.vlgmr.msra.gmra.mrb[20].mxu0 %v1272_v2 }
0x1078   : > { %v1378_v3 = vpop.f32.mrb[20].mxu0 }
0x1079   : > { %v1379_v4 = vadd.f32 %v1489_v8, %v1378_v3  ;;  %v1647_v5 = vpop.f32.mrb[21].mxu0 }
0x107a   : > { %v1381_v29 = vpop.f32.mrb[22].mxu0 }
0x107b   : > { %v1384_v6 = vadd.f32 %v1379_v4, %v2073_v32  ;;  %v1648_v7 = vpop.f32.mrb[23].mxu0 }
0x107d   : > { %1385 = vst.msk [vmem:[%s431_s23] sm:$0xff] %vm440_vm0, %v1384_v6 }
0x107e   : > { %1746 = shalt.err (!%p1743_p3)
}
0x107f   : > { %s1747_s0 = scalar_lea.hbm %s2136_s1, 128  ;;  %s1751_s23 = scalar_lea.hbm %s2192_s13, 256 }
0x1080   : > { %p1748_p4 = scmp.ne.s32.totalorder %s2136_s1, %s1747_s0  ;;  %p1752_p9 = scmp.lt.u32.totalorder %s2136_s1, %s2192_s13 }
0x1081   : > { %p1753_p10 = scmp.lt.u32.totalorder %s1751_s23, %s1747_s0  ;;  %p1755_p12 = scmp.lt.u32.totalorder %s1747_s0, %s2136_s1 }
0x1082   : > { %p1749_p7 = pnand %p1748_p4, %p1919_p5 }
0x1083   : > { %p1754_p11 = por %p1753_p10, %p1752_p9 }
0x1084   : > { %p1750_p8 = pneg %p1749_p7 }
0x1085   : > { %p1756_p13 = por %p1755_p12, %p1754_p11 }
0x1087   : > { %p1757_p0 = pnand %p1756_p13, %p1750_p8 }
0x1089   : > { %1760 = shalt.err (!%p1757_p0)
}
0x108a   : > { %1649 = dma.vmem_to_hbm [thread:$0]  (%p1919_p5), %s2138_s24, 128, %s2136_s1, %s1387_s29  }
0x108b PF: > { %p1655_p1 = scmp.ge.s32.totalorder %s1795_s28, 2  ;;  %s1412_s2 = sand.u32 1, %s1783_s25  }
0x108c   : > { %s1413_s16 = scalar_lea.sflag [#allocation3], %s1412_s2 }
0x108d   : > { %p1652_p2 = pnand %p1655_p1, %p1923_p6 }
0x108f   : > { %1778 = dma.done.wait (!%p1652_p2), %s1413_s16, 128  }
0x1090   : > { %1780 = vsyncadd (!%p1652_p2), %s1413_s16, 4294967168  ;;  %p23_p3 = scmp.ge.s32.totalorder %s1906_s14, 4   ;;  %s2201_s25 = smov %s1787_s26 }
0x1091   : > { %s2202_s26 = smov %s1791_s27  ;;  %s2203_s27 = smov %s1917_s17 }
0x1092   : > { %s2204_s28 = smov %s1906_s14  ;;  %25 = sbr.rel (!%p23_p3) target bundleno = 7 (0x7), region = 107 }
0x1099   :  { %1418 = vsyncpa [#allocation3], 1 }
0x109a   :  { %1420 = vsyncpa [#allocation3 + $0x1], 1 }

</bundles_post_ra>
